<compile_context>
chip_gen: v7x
topology: tpu7x:2x2x1
jax: 0.10.0
libtpu: 0.0.40
codegen_flags: <defaults>
</compile_context>

<pallas_src>
import jax
import jax.numpy as jnp
from jax.experimental import pallas as pl
from jax.experimental.pallas import tpu as pltpu


def _round_up(x, m):
    return (x + m - 1) // m * m


def mlp_kernel(x_ref, w1_ref, b1_ref, w2_ref, b2_ref, o_ref):
    # fc1 on the MXU: x arrives f32 (single HBM pass) and is cast to bf16 here
    # on the VPU; W1 is already bf16.  f32 accumulation.
    x_bf16 = x_ref[...].astype(jnp.bfloat16)
    h = jnp.dot(x_bf16, w1_ref[...], preferred_element_type=jnp.float32)  # [TB, H]
    # Bias + ReLU in f32 on the VPU (v5e has no bf16 VPU/EUP).
    h = jnp.maximum(h + b1_ref[...], 0.0)
    # fc2 has a single output unit: VPU multiply + XLU lane-reduce instead of a
    # 1-wide MXU matmul.  -> [TB, 1] column.
    col = jnp.sum(h * w2_ref[...], axis=-1, keepdims=True)
    col = col + b2_ref[0]                       # scalar fc2 bias from SMEM
    sig = jax.nn.sigmoid(col)                   # exp/recip on the EUP
    # One small XLU relayout: [TB, 1] column -> [1, TB] row so the store is a
    # lane-dense (unmasked) vst with batch on the lane axis.
    row = jnp.transpose(sig, (1, 0))
    o_ref[...] = row.reshape(o_ref.shape).astype(o_ref.dtype)


def net_forward(x, w1, b1, w2, b2):
    """Forward pass of Net.

    x:  [B, D_in] f32
    w1: [D_in, H]  fc1 weight (transposed to [in, out])
    b1: [H]        fc1 bias
    w2: [H, D_out] fc2 weight (transposed), D_out == 1
    b2: [D_out]    fc2 bias
    """
    B, D_in = x.shape
    H = w1.shape[1]
    D_out = w2.shape[1]
    assert D_out == 1, "VPU+reduce fc2 path assumes a single output unit"

    # Batch tile: multiple of 8 (sublane); >= 2 tiles once B > 8 so the
    # "parallel" batch axis shards across both TensorCores on v7x; grows with B
    # to amortize the ~0.35us/step pipeline overhead and keep DMAs efficient.
    if B <= 8:
        TB = _round_up(max(B, 1), 8)
    elif B <= 2048:
        TB = _round_up(pl.cdiv(B, 2), 8)                 # exactly 2 tiles
    else:
        TB = min(4096, _round_up(pl.cdiv(B, 2), 128))    # big tiles, >= 2
    num_tiles = pl.cdiv(B, TB)

    # Weights are reused across calls -> pre-cast once; activations stay f32 in
    # HBM and are cast inside the kernel.
    w1_bf16 = w1.astype(jnp.bfloat16)
    b1_row = b1.reshape(1, H).astype(jnp.float32)
    w2_row = w2.T.astype(jnp.float32)          # [1, H], f32 for the VPU path
    b2_scalar = b2.reshape(1).astype(jnp.float32)

    # Rough per-step VMEM budget (double-buffered blocks + f32 temporaries);
    # keep comfortably under v7x's 64 MiB physical VMEM.
    est = (2 * TB * D_in * 4            # x tile (f32, double-buffered)
           + 2 * D_in * H * 2           # W1 (bf16)
           + 4 * H * 4                  # b1 / w2 rows
           + 2 * TB * H * 4             # h + h*w2 f32 temporaries
           + 2 * 8 * TB * 4)            # output row tile
    vmem_limit = int(min(max(2 * est, 32 << 20), 48 << 20))

    grid_spec = pl.GridSpec(
        grid=(num_tiles,),
        in_specs=[
            pl.BlockSpec((TB, D_in), lambda i: (i, 0)),        # x: tiled over batch
            pl.BlockSpec((D_in, H), lambda i: (0, 0)),         # W1: VMEM-resident
            pl.BlockSpec((1, H), lambda i: (0, 0)),            # b1 row
            pl.BlockSpec((1, H), lambda i: (0, 0)),            # w2 row
            pl.BlockSpec(memory_space=pltpu.MemorySpace.SMEM), # b2 scalar
        ],
        # Lane-dense output: one [1, TB] row per grid step (batch on lanes).
        out_specs=pl.BlockSpec((1, 1, TB), lambda i: (i, 0, 0)),
    )

    out_rows = pl.pallas_call(
        mlp_kernel,
        out_shape=jax.ShapeDtypeStruct((num_tiles, 1, TB), jnp.float32),
        grid_spec=grid_spec,
        compiler_params=pltpu.CompilerParams(
            dimension_semantics=("parallel",),   # batch axis: megacore on v7x
            vmem_limit_bytes=vmem_limit,
        ),
    )(x.astype(jnp.float32), w1_bf16, b1_row, w2_row, b2_scalar)
    # TODO(synk): if H is scaled far beyond 256, add an "arbitrary" H-tile grid
    # axis with a [TB,1] f32 accumulator scratch (pl.when init / sigmoid+store
    # on the last tile) and K-tile W1 to stay under v7x's 64 MiB VMEM.

    # Un-pad: rows are tile-major, batch within a tile on the lane axis.
    return out_rows.reshape(num_tiles * TB, 1)[:B]


if __name__ == "__main__":
    # Small shapes consistent with the module:
    # Linear(input_size, 256) -> ReLU -> Linear(256, 1) -> Sigmoid.
    batch = 8
    input_size = 32
    hidden_size = 256
    output_size = 1

    key = jax.random.PRNGKey(0)
    kx, kw1, kb1, kw2, kb2 = jax.random.split(key, 5)

    x = jax.random.normal(kx, (batch, input_size), dtype=jnp.float32)

    # Deterministic init mimicking nn.Linear's uniform(-1/sqrt(fan_in), 1/sqrt(fan_in)).
    bound1 = 1.0 / jnp.sqrt(input_size)
    w1 = jax.random.uniform(kw1, (input_size, hidden_size), jnp.float32, -bound1, bound1)
    b1 = jax.random.uniform(kb1, (hidden_size,), jnp.float32, -bound1, bound1)
    bound2 = 1.0 / jnp.sqrt(hidden_size)
    w2 = jax.random.uniform(kw2, (hidden_size, output_size), jnp.float32, -bound2, bound2)
    b2 = jax.random.uniform(kb2, (output_size,), jnp.float32, -bound2, bound2)

    out = jax.block_until_ready(net_forward(x, w1, b1, w2, b2))

    # Pure-JAX reference with the same bf16 rounding applied to the fc1 operands.
    xh = x.astype(jnp.bfloat16).astype(jnp.float32)
    w1h = w1.astype(jnp.bfloat16).astype(jnp.float32)
    h_ref = jnp.maximum(xh @ w1h + b1.reshape(1, -1), 0.0)
    ref = jax.nn.sigmoid(h_ref @ w2 + b2.reshape(1, -1))

    assert out.shape == (batch, output_size), out.shape
    err = float(jnp.max(jnp.abs(out - ref)))
    assert jnp.allclose(out, ref, atol=2e-4, rtol=2e-4), err

    print("KERNEL_OK")
</pallas_src>

<mosaic_0001>
module attributes {stable_mosaic.version = 11 : i64} {
  func.func @mlp_kernel(%arg0: i32, %arg1: memref<8x32xf32, #tpu.memory_space<vmem>>, %arg2: memref<32x256xbf16, #tpu.memory_space<vmem>>, %arg3: memref<1x256xf32, #tpu.memory_space<vmem>>, %arg4: memref<1x256xf32, #tpu.memory_space<vmem>>, %arg5: memref<1xf32, #tpu.memory_space<smem>>, %arg6: memref<1x1x8xf32, #tpu.memory_space<vmem>>) attributes {dimension_semantics = [#tpu.dimension_semantics<parallel>], iteration_bounds = array<i64: 1>, scalar_prefetch = 0 : i64, scratch_operands = 0 : i64, tpu.core_type = #tpu.core_type<tc>, window_params = [{transform_indices = @transform_0, window_bounds = array<i64: 8, 32>}, {pipeline_mode = #tpu.pipeline_mode<synchronous>, transform_indices = @transform_1, window_bounds = array<i64: 32, 256>}, {pipeline_mode = #tpu.pipeline_mode<synchronous>, transform_indices = @transform_2, window_bounds = array<i64: 1, 256>}, {pipeline_mode = #tpu.pipeline_mode<synchronous>, transform_indices = @transform_3, window_bounds = array<i64: 1, 256>}, {transform_indices = @transform_4, window_bounds = array<i64: 1>}, {transform_indices = @transform_5, window_bounds = array<i64: 1, 1, 8>}]} {
    %c0 = arith.constant 0 : index
    %c0_0 = arith.constant 0 : index
    %0 = vector.load %arg1[%c0, %c0_0] : memref<8x32xf32, #tpu.memory_space<vmem>>, vector<8x32xf32>
    %1 = arith.truncf %0 : vector<8x32xf32> to vector<8x32xbf16>
    %c0_1 = arith.constant 0 : index
    %c0_2 = arith.constant 0 : index
    %2 = vector.load %arg2[%c0_1, %c0_2] : memref<32x256xbf16, #tpu.memory_space<vmem>>, vector<32x256xbf16>
    %cst = arith.constant dense<0.000000e+00> : vector<8x256xf32>
    %3 = tpu.matmul %1, %2, %cst {dimension_numbers = #tpu.dot_dimension_numbers<[1], [0], [0], [1], [0, 0, 1, 1], [], []>} : vector<8x32xbf16>, vector<32x256xbf16>, vector<8x256xf32> -> vector<8x256xf32>
    %c0_3 = arith.constant 0 : index
    %c0_4 = arith.constant 0 : index
    %4 = vector.load %arg3[%c0_3, %c0_4] : memref<1x256xf32, #tpu.memory_space<vmem>>, vector<1x256xf32>
    %5 = vector.broadcast %4 : vector<1x256xf32> to vector<8x256xf32>
    %6 = arith.addf %3, %5 : vector<8x256xf32>
    %cst_5 = arith.constant 0.000000e+00 : f32
    %7 = vector.broadcast %cst_5 : f32 to vector<8x256xf32>
    %8 = arith.maximumf %6, %7 : vector<8x256xf32>
    %c0_6 = arith.constant 0 : index
    %c0_7 = arith.constant 0 : index
    %9 = vector.load %arg4[%c0_6, %c0_7] : memref<1x256xf32, #tpu.memory_space<vmem>>, vector<1x256xf32>
    %10 = vector.broadcast %9 : vector<1x256xf32> to vector<8x256xf32>
    %11 = arith.mulf %8, %10 : vector<8x256xf32>
    %cst_8 = arith.constant dense<0.000000e+00> : vector<8xf32>
    %12 = vector.multi_reduction <add>, %11, %cst_8 [1] : vector<8x256xf32> to vector<8xf32>
    %13 = vector.shape_cast %12 : vector<8xf32> to vector<8x1xf32>
    %c0_9 = arith.constant 0 : index
    %14 = memref.load %arg5[%c0_9] : memref<1xf32, #tpu.memory_space<smem>>
    %15 = vector.broadcast %14 : f32 to vector<8x1xf32>
    %16 = arith.addf %13, %15 : vector<8x1xf32>
    %17 = arith.negf %16 : vector<8x1xf32>
    %18 = math.exp %17 : vector<8x1xf32>
    %cst_10 = arith.constant 1.000000e+00 : f32
    %19 = vector.broadcast %cst_10 : f32 to vector<8x1xf32>
    %20 = arith.addf %19, %18 : vector<8x1xf32>
    %21 = arith.divf %19, %20 : vector<8x1xf32>
    %22 = tpu.transpose %21, [1, 0] : vector<8x1xf32> -> vector<1x8xf32>
    %23 = vector.shape_cast %22 : vector<1x8xf32> to vector<1x1x8xf32>
    %c0_11 = arith.constant 0 : index
    %c0_12 = arith.constant 0 : index
    %c0_13 = arith.constant 0 : index
    %24 = vector.load %arg6[%c0_11, %c0_12, %c0_13] : memref<1x1x8xf32, #tpu.memory_space<vmem>>, vector<1x1x8xf32>
    tpu.vector_store %arg6[%c0_11, %c0_12, %c0_13], %23 {strides = array<i32>} : memref<1x1x8xf32, #tpu.memory_space<vmem>>, vector<1x1x8xf32>,
    return
  }
  func.func @transform_0(%arg0: i32) -> (i32, i32) {
    %c0_i32 = arith.constant 0 : i32
    %c0_i32_0 = arith.constant 0 : i32
    return %arg0, %c0_i32 : i32, i32
  }
  func.func @transform_1(%arg0: i32) -> (i32, i32) {
    %c0_i32 = arith.constant 0 : i32
    %c0_i32_0 = arith.constant 0 : i32
    %c0_i32_1 = arith.constant 0 : i32
    return %c0_i32, %c0_i32_0 : i32, i32
  }
  func.func @transform_2(%arg0: i32) -> (i32, i32) {
    %c0_i32 = arith.constant 0 : i32
    %c0_i32_0 = arith.constant 0 : i32
    %c0_i32_1 = arith.constant 0 : i32
    return %c0_i32, %c0_i32_0 : i32, i32
  }
  func.func @transform_3(%arg0: i32) -> (i32, i32) {
    %c0_i32 = arith.constant 0 : i32
    %c0_i32_0 = arith.constant 0 : i32
    %c0_i32_1 = arith.constant 0 : i32
    return %c0_i32, %c0_i32_0 : i32, i32
  }
  func.func @transform_4(%arg0: i32) -> i32 {
    %c0_i32 = arith.constant 0 : i32
    %c0_i32_0 = arith.constant 0 : i32
    return %c0_i32 : i32
  }
  func.func @transform_5(%arg0: i32) -> (i32, i32, i32) {
    %c0_i32 = arith.constant 0 : i32
    %c0_i32_0 = arith.constant 0 : i32
    %c0_i32_1 = arith.constant 0 : i32
    return %arg0, %c0_i32, %c0_i32_0 : i32, i32, i32
  }
}

</mosaic_0001>

<bundles_post_ra>
// kernel: tpu_custom_call.1
= control target key start
LH: loop header
LB: loop body
LE: loop exit
PB: predicated region body
PF: predicated region fallthrough
CT: control target
= control target key end

     0   :  { %11 = vsyncpa [#allocation4], 0  ;;  %s393_s0 = inlined_call_operand.hbm [shape: f32[8,32], index: 0, kind: input, shape index: {}]   ;;  %s394_s1 = inlined_call_operand.hbm [shape: bf16[32,256], index: 1, kind: input, shape index: {}]   ;;  %s395_s2 = inlined_call_operand.vmem [shape: f32[1,256], index: 2, kind: input, shape index: {}]   ;;  %s396_s3 = inlined_call_operand.vmem [shape: f32[1,256], index: 3, kind: input, shape index: {}]   ;;  %s397_s4 = inlined_call_operand.<no memory space> [shape: f32[1], index: 4, kind: input, shape index: {}]   ;;  %s398_s5 = inlined_call_operand.hbm [shape: f32[1,1,8], index: 5, kind: output, shape index: {}]  }
   0x1   :  { %12 = vsyncpa [#allocation7], 0 }
   0x2   :  { %13 = vsyncpa [#allocation5], 0  ;;  %s305_s18 = smov [#allocation3]   ;;  %s306_s20 = smov [#allocation6]  }
   0x3   :  { %s20_s19 = sshll.u32 %s305_s18, 4  ;;  %s29_s21 = sshll.u32 %s306_s20, 4  ;;  %s21_s19 = int_to_ptr.vmem [resolvable:$true] %s20_s19  ;;  %s341_s21 = int_to_ptr.vmem [resolvable:$true] %s29_s21 }
   0x4   :  { %s233_s24 = scalar_lea.hbm %s393_s0, 128 }
   0x5   :  { %p234_p0 = scmp.ne.s32.totalorder %s393_s0, %s233_s24  ;;  %p237_p1 = scmp.lt.u32.totalorder %s233_s24, %s393_s0 }
   0x7   :  { %p239_p2 = pnand %p237_p1, %p234_p0 }
   0x9   :  { %242 = shalt.err (!%p239_p2)
}
   0xa   :  { %s243_s29 = scalar_lea.vmem %s21_s19, 128  ;;  %p248_p4 = scmp.lt.s32.totalorder %s21_s19, %s21_s19 }
   0xb   :  { %p244_p3 = scmp.ne.s32.totalorder %s21_s19, %s243_s29  ;;  %p249_p5 = scmp.lt.s32.totalorder %s243_s29, %s243_s29 }
   0xd   :  { %p250_p6 = por %p249_p5, %p248_p4 }
   0xf   :  { %p251_p7 = pnand %p250_p6, %p244_p3 }
  0x11   :  { %254 = shalt.err (!%p251_p7)
}
  0x12   :  { %23 = dma.hbm_to_vmem [thread:$0]  %s393_s0, 128, %s21_s19, [#allocation4]  }
  0x13   :  { %s255_s9 = scalar_lea.hbm %s394_s1, 512 }
  0x14   :  { %p256_p8 = scmp.ne.s32.totalorder %s394_s1, %s255_s9  ;;  %p259_p9 = scmp.lt.u32.totalorder %s255_s9, %s394_s1 }
  0x16   :  { %p261_p10 = pnand %p259_p9, %p256_p8 }
  0x18   :  { %264 = shalt.err (!%p261_p10)
}
  0x19   :  { %s265_s14 = scalar_lea.vmem %s341_s21, 512  ;;  %p270_p12 = scmp.lt.s32.totalorder %s341_s21, %s341_s21 }
  0x1a   :  { %p266_p11 = scmp.ne.s32.totalorder %s341_s21, %s265_s14  ;;  %p271_p13 = scmp.lt.s32.totalorder %s265_s14, %s265_s14 }
  0x1c   :  { %p272_p0 = por %p271_p13, %p270_p12 }
  0x1e   :  { %p273_p1 = pnand %p272_p0, %p266_p11 }
  0x20   :  { %276 = shalt.err (!%p273_p1)
}
  0x21   :  { %s307_s0 = smov 128   ;;  %s308_s15 = smov 8  }
  0x22   :  { %35 = dma.hbm_to_vmem [thread:$0]  %s394_s1, 512, %s341_s21, [#allocation7], %s307_s0, %s307_s0, %s308_s15  }
  0x23   :  { %299 = dma.done.wait [#allocation4], 128  }
  0x24   :  { %300 = vsyncadd [#allocation4], 4294967168 }
  0x25   :  { %301 = dma.done.wait [#allocation7], 512  }
  0x26   :  { %302 = vsyncadd [#allocation7], 4294966784  ;;  %v309_v0 = vmov 0   ;;  %v223_v1 = vld [vmem:[#allocation6 + $0x4] ss:$8 sps:$4 sm:$0xff]   ;;  %v49_v5 = vld [vmem:[#allocation3] sm:$0xff]  ;;  %v57_v7 = vlaneseq  ;;  %v152_v28 = vstv %s397_s4 }
  0x27   :  { %123 = vmatprep.mubr.bf16.mxu0 %v309_v0  ;;  %v225_v2 = vld [vmem:[#allocation6] ss:$8 sps:$4 sm:$0xff]   ;;  %91 = vmatprep.subr.bf16.mxu0 %v223_v1  ;;  %v226_v3 = vld [vmem:[#allocation6 + $0x14] ss:$8 sps:$4 sm:$0xff]   ;;  %v228_v4 = vld [vmem:[#allocation6 + $0x10] ss:$8 sps:$4 sm:$0xff]   ;;  %v50_v6 = vpack.c.bf16 %v49_v5, %v49_v5 }
  0x28   :  { %92 = vmatpush1.bf16.msra.mxu0 %v225_v2  ;;  %vm87_vm0 = vcmask 261120   ;;  %v58_v8 = vshrl.u32 %v57_v7, 7  ;;  %v55_v10 = vld [vmem:[%s395_s2] sm:$0x3]  ;;  %vm192_vm1 = vcmask 57344  }
  0x29   :  { %93 = vmatprep.subr.bf16.mxu0 %v226_v3  ;;  %v134_v14 = vld [vmem:[%s396_s3] sm:$0x3]  ;;  %s310_s3 = smov [#allocation8]  }
  0x2a   :  { %v59_v9 = vsub.s32 0, %v58_v8  ;;  %v63_v11 = vsub.s32 1, %v58_v8  ;;  %s200_s22 = sshll.u32 %s310_s3, 4  ;;  %s201_s22 = int_to_ptr.vmem [resolvable:$true] %s200_s22 }
  0x2b   :  { %s277_s23 = scalar_lea.vmem %s201_s22, 16  ;;  %s281_s24 = scalar_lea.vmem %s201_s22, 32 }
  0x2c   :  { %94 = vmatpush1.bf16.msra.mxu0 %v228_v4  ;;  %v60_v12 = vrot.slane %v55_v10, %v59_v9  ;;  %v64_v13 = vrot.slane %v55_v10, %v63_v11  ;;  %v139_v18 = vrot.slane %v134_v14, %v59_v9  ;;  %v143_v21 = vrot.slane %v134_v14, %v63_v11  ;;  %p278_p2 = scmp.ne.s32.totalorder %s201_s22, %s277_s23  ;;  %p282_p3 = scmp.lt.s32.totalorder %s201_s22, %s201_s22 }
  0x2d   :  { %p283_p4 = scmp.lt.s32.totalorder %s281_s24, %s277_s23 }
  0x2f   :  { %214 = vmatmul.mubr.msk.bf16.vlgmr.msra.gmra.mrb[0].mxu0 %vm87_vm0, %v50_v6  ;;  %p284_p5 = por %p283_p4, %p282_p3 }
  0x31   :  { %p285_p6 = pnand %p284_p5, %p278_p2 }
 0x102   :  { %v125_v15 = vpop.f32.mrb[0].mxu0 }
 0x103   :  { %v126_v16 = vadd.f32 %v125_v15, %v60_v12  ;;  %v127_v17 = vpop.f32.mrb[1].mxu0 }
 0x104   :  { %v128_v19 = vadd.f32 %v127_v17, %v64_v13  ;;  %v129_v20 = vpop.f32.mrb[2].mxu0 }
 0x105   :  { %v132_v22 = vmax.f32 %v126_v16, 0.0  ;;  %v130_v23 = vpop.f32.mrb[3].mxu0 }
 0x106   :  { %v133_v24 = vmax.f32 %v128_v19, 0.0 }
 0x107   :  { %v146_v25 = vmul.f32 %v139_v18, %v132_v22 }
 0x108   :  { %v147_v26 = vmul.f32 %v143_v21, %v133_v24 }
 0x10a   :  { %v148_v27 = vadd.f32 %v147_v26, %v146_v25 }
 0x10c   :  { %149 = vadd.xlane.f32.xlu0 %v148_v27 }
 0x199   :  { %v150_v29 = vpop.xlane.xlu0 %149 }
 0x19a   :  { %v153_v30 = vadd.f32 %v152_v28, %v150_v29 }
 0x19c   :  { %v215_v31 = vmul.f32 -1.442695, %v153_v30 }
 0x19e   :  { %229 = vpow2.f32 %v215_v31 }
 0x1a8   :  { %v230_v32 = vpop.eup %229 }
 0x1a9   :  { %v157_v33 = vadd.f32 1.0, %v230_v32 }
 0x1ab   :  { %231 = vrcp.f32 %v157_v33 }
 0x1b5   :  { %v232_v34 = vpop.eup %231 }
 0x1b6   :  { %160 = vxpose.xlu0.b32.start.end [1/1] (short) (narrow) %v232_v34, 8 }
 0x236   :  { %v176_v35 = vpop.trf.xlu0 }
 0x237   :  { %193 = vst.msk [vmem:[#allocation8] sm:$0x1] %vm192_vm1, %v176_v35 }
 0x238   :  { %288 = shalt.err (!%p285_p6)
}
 0x239   :  { %s289_s26 = scalar_lea.hbm %s398_s5, 16 }
 0x23a   :  { %p290_p7 = scmp.ne.s32.totalorder %s398_s5, %s289_s26  ;;  %p293_p8 = scmp.lt.u32.totalorder %s289_s26, %s398_s5 }
 0x23c   :  { %p295_p9 = pnand %p293_p8, %p290_p7 }
 0x23e   :  { %298 = shalt.err (!%p295_p9)
}
 0x23f   :  { %203 = dma.vmem_to_hbm [thread:$0]  %s201_s22, 16, %s398_s5, [#allocation5]  }
 0x240   :  { %303 = dma.done.wait [#allocation5], 16  }
 0x241   :  { %304 = vsyncadd [#allocation5], 4294967280 }
 0x242   :  { %207 = vsyncpa [#allocation4], 1 }
 0x243   :  { %208 = vsyncpa [#allocation7], 1 }
 0x244   :  { %209 = vsyncpa [#allocation5], 1 }

</bundles_post_ra>
